<compile_context>
chip_gen: v6e
topology: v6e:2x2x1
jax: 0.10.0
libtpu: 0.0.40
codegen_flags: <defaults>
</compile_context>

<pallas_src>
import jax
import jax.numpy as jnp
from jax.experimental import pallas as pl
from jax.experimental.pallas import tpu as pltpu


def _round_up(x, m):
    return (x + m - 1) // m * m


def _cdiv(a, b):
    return -(-a // b)


def _vmem_capacity_bytes():
    try:
        return int(pltpu.get_tpu_info().vmem_capacity_bytes)
    except Exception:
        return 64 << 20  # conservative fallback (v7x per-TensorCore VMEM)


# --------------------------------------------------------------------------- kernels
def _ffn_kernel_out_acc(x_ref, w1_ref, b1_ref, w2_ref, b2_ref, o_ref):
    """Grid step (row-tile i, ff-tile fk).  o_ref is f32 and doubles as the
    accumulator: its block index is constant across fk, so it stays VMEM-resident.

    x_ref : (tm, E)   row tile of the flattened/padded input
    w1_ref: (E, tf)   W1 slice, NN orientation (already transposed in the wrapper)
    b1_ref: (1, tf)   linear1 bias slice (f32)
    w2_ref: (tf, E)   W2 slice, NN orientation
    b2_ref: (1, E)    linear2 bias (f32)
    o_ref : (tm, E)   f32 output tile / accumulator
    """
    fk = pl.program_id(1)

    # h = relu(x @ W1[:, f_tile] + b1[f_tile])   -- f32 accumulation on the MXU
    h = jnp.dot(x_ref[...], w1_ref[...], preferred_element_type=jnp.float32)
    h = jnp.maximum(h + b1_ref[...], 0.0)

    # partial second matmul: h @ W2[f_tile, :]
    p = jnp.dot(h.astype(w2_ref.dtype), w2_ref[...],
                preferred_element_type=jnp.float32)

    @pl.when(fk == 0)
    def _():
        o_ref[...] = p + b2_ref[...]          # b2 added exactly once

    @pl.when(fk > 0)
    def _():
        o_ref[...] = o_ref[...] + p


def _ffn_kernel_scratch_acc(x_ref, w1_ref, b1_ref, w2_ref, b2_ref, o_ref, acc_ref):
    """Same as above but with a separate f32 accumulator, used when the output
    dtype is narrower than f32 (e.g. bf16 activations end-to-end)."""
    fk = pl.program_id(1)

    @pl.when(fk == 0)
    def _():
        acc_ref[...] = jnp.zeros_like(acc_ref)

    h = jnp.dot(x_ref[...], w1_ref[...], preferred_element_type=jnp.float32)
    h = jnp.maximum(h + b1_ref[...], 0.0)
    acc_ref[...] += jnp.dot(h.astype(w2_ref.dtype), w2_ref[...],
                            preferred_element_type=jnp.float32)

    @pl.when(fk == pl.num_programs(1) - 1)
    def _():
        o_ref[...] = (acc_ref[...] + b2_ref[...]).astype(o_ref.dtype)


# --------------------------------------------------------------------------- wrapper
def feed_forward(x, w1, b1, w2, b2, *, tm=512, tf=1024, compute_dtype=jnp.bfloat16):
    """Fused Linear -> ReLU -> Linear (PyTorch FeedForward.forward).

    x : [..., embed_dim]
    w1: [ff_dim, embed_dim], b1: [ff_dim]       (PyTorch nn.Linear layouts)
    w2: [embed_dim, ff_dim], b2: [embed_dim]

    compute_dtype: MXU dtype for x / weights (default bf16; all MXU peaks are bf16).
    Biases and the accumulation stay f32; the output is cast back to x.dtype.
    Pass compute_dtype=jnp.float32 (or None) for an exact-precision path.
    """
    orig_shape = x.shape
    orig_dtype = x.dtype
    E = orig_shape[-1]
    F = w1.shape[0]

    x2d = x.reshape(-1, E)
    M = x2d.shape[0]

    cdt = orig_dtype if compute_dtype is None else compute_dtype
    x2d = x2d.astype(cdt)
    # NN orientation: contraction dim on the RHS sublane axis for both matmuls.
    w1_t = w1.astype(cdt).T            # (E, F)
    w2_t = w2.astype(cdt).T            # (F, E)
    b1f = b1.astype(jnp.float32).reshape(1, F)
    b2f = b2.astype(jnp.float32).reshape(1, E)

    in_item = jnp.dtype(cdt).itemsize
    out_item = jnp.dtype(orig_dtype).itemsize
    use_out_as_acc = jnp.dtype(orig_dtype) == jnp.dtype(jnp.float32)

    # ---- tile sizes ---------------------------------------------------------
    E_pad = _round_up(E, 128)
    F_r128 = _round_up(F, 128)

    # tm: multiples of 256 (MXU-native) when large, else multiples of 16 (bf16
    # sublane packing), never past the (rounded) row count.
    tm = max(16, min(tm, _round_up(M, 16)))
    if tm >= 256:
        tm256 = (tm // 256) * 256
        tm16 = _round_up(tm, 16)
        tm = tm256 if _round_up(M, tm256) <= _round_up(M, tm16) else tm16
    else:
        tm = _round_up(tm, 16)
    # Ensure >=2 parallel row tiles when there is enough work (v7x has 2 TCs).
    if M >= 512 and _cdiv(M, tm) < 2:
        tm = max(256, _round_up(_cdiv(M, 2), 256))

    # tf: FFN tile, multiple of 128, no larger than the padded FFN dim.
    tf = max(128, min(tf, F_r128))
    tf = _round_up(tf, 128)

    # ---- fit the double-buffered working set into this generation's VMEM -----
    vmem_cap = int(_vmem_capacity_bytes() * 0.85)

    def _need(tm_, tf_):
        blk = (tm_ * E_pad * in_item          # x tile
               + E_pad * tf_ * in_item        # W1 tile (E, tf)
               + tf_ * 4                      # b1 tile
               + tf_ * E_pad * in_item        # W2 tile (tf, E)
               + E_pad * 4                    # b2
               + tm_ * E_pad * out_item)      # out tile
        acc = 0 if use_out_as_acc else tm_ * E_pad * 4
        return 2 * blk + acc + (2 << 20)

    while _need(tm, tf) > vmem_cap and (tm > 256 or tf > 256):
        if tf >= tm and tf > 256:
            tf = _round_up(tf // 2, 128)
        elif tm > 256:
            tm = _round_up(tm // 2, 16)
        else:
            tf = _round_up(tf // 2, 128)

    vmem_limit = int(min(vmem_cap, max(_need(tm, tf), 32 << 20)))

    # ---- padding (skipped entirely when shapes are already aligned) ----------
    M_pad = _round_up(M, tm)
    F_pad = _round_up(F, tf)

    x_p = jnp.pad(x2d, ((0, M_pad - M), (0, E_pad - E))) \
        if (M_pad != M or E_pad != E) else x2d
    w1_p = jnp.pad(w1_t, ((0, E_pad - E), (0, F_pad - F))) \
        if (E_pad != E or F_pad != F) else w1_t
    w2_p = jnp.pad(w2_t, ((0, F_pad - F), (0, E_pad - E))) \
        if (E_pad != E or F_pad != F) else w2_t
    b1_p = jnp.pad(b1f, ((0, 0), (0, F_pad - F))) if F_pad != F else b1f
    b2_p = jnp.pad(b2f, ((0, 0), (0, E_pad - E))) if E_pad != E else b2f

    grid = (M_pad // tm, F_pad // tf)

    cost = pl.CostEstimate(
        flops=int(4 * M_pad * E_pad * F_pad),   # two matmuls, 2*M*E*F flops each
        transcendentals=0,
        bytes_accessed=int(x_p.size * in_item
                           + grid[0] * (w1_p.size + w2_p.size) * in_item
                           + b1_p.size * 4 + b2_p.size * 4
                           + M_pad * E_pad * out_item),
    )

    in_specs = [
        pl.BlockSpec((tm, E_pad), lambda i, fk: (i, 0)),    # x row tile
        pl.BlockSpec((E_pad, tf), lambda i, fk: (0, fk)),   # W1 (E, F) F-tile
        pl.BlockSpec((1, tf), lambda i, fk: (0, fk)),       # b1 F-tile
        pl.BlockSpec((tf, E_pad), lambda i, fk: (fk, 0)),   # W2 (F, E) F-tile
        pl.BlockSpec((1, E_pad), lambda i, fk: (0, 0)),     # b2 (constant block)
    ]
    out_spec = pl.BlockSpec((tm, E_pad), lambda i, fk: (i, 0))

    if use_out_as_acc:
        kernel = _ffn_kernel_out_acc
        scratch_shapes = []
    else:
        kernel = _ffn_kernel_scratch_acc
        scratch_shapes = [pltpu.VMEM((tm, E_pad), jnp.float32)]

    out = pl.pallas_call(
        kernel,
        out_shape=jax.ShapeDtypeStruct((M_pad, E_pad), orig_dtype),
        grid_spec=pltpu.PrefetchScalarGridSpec(
            num_scalar_prefetch=0,
            grid=grid,
            in_specs=in_specs,
            out_specs=out_spec,
            scratch_shapes=scratch_shapes,
        ),
        compiler_params=pltpu.CompilerParams(
            dimension_semantics=("parallel", "arbitrary"),
            vmem_limit_bytes=vmem_limit,
        ),
        cost_estimate=cost,
    )(x_p, w1_p, b1_p, w2_p, b2_p)

    if M_pad != M or E_pad != E:
        out = out[:M, :E]
    return out.reshape(orig_shape)


def init_params(key, embed_dim, ff_dim, dtype=jnp.float32):
    # Deterministic init mimicking nn.Linear's uniform(-1/sqrt(fan_in), 1/sqrt(fan_in)).
    k1, k2, k3, k4 = jax.random.split(key, 4)
    lim1 = 1.0 / jnp.sqrt(embed_dim)
    lim2 = 1.0 / jnp.sqrt(ff_dim)
    w1 = jax.random.uniform(k1, (ff_dim, embed_dim), dtype, -lim1, lim1)
    b1 = jax.random.uniform(k2, (ff_dim,), dtype, -lim1, lim1)
    w2 = jax.random.uniform(k3, (embed_dim, ff_dim), dtype, -lim2, lim2)
    b2 = jax.random.uniform(k4, (embed_dim,), dtype, -lim2, lim2)
    return w1, b1, w2, b2


if __name__ == "__main__":
    key = jax.random.PRNGKey(0)
    batch, seq, embed_dim, ff_dim = 2, 8, 32, 64

    kx, kp = jax.random.split(key)
    x = jax.random.normal(kx, (batch, seq, embed_dim), jnp.float32)
    w1, b1, w2, b2 = init_params(kp, embed_dim, ff_dim)

    # Pure-JAX reference (PyTorch semantics: x @ W1^T + b1 -> relu -> @ W2^T + b2).
    ref = jnp.maximum(x @ w1.T + b1, 0.0) @ w2.T + b2

    # Exact f32 MXU path (exercises the out-as-accumulator kernel), tight check.
    out_f32 = jax.block_until_ready(
        feed_forward(x, w1, b1, w2, b2, compute_dtype=jnp.float32))
    assert out_f32.shape == x.shape
    assert jnp.allclose(out_f32, ref, atol=1e-5, rtol=1e-5)

    # Default bf16 MXU path (f32 bias + f32 accumulation), loose check.
    out_bf = jax.block_until_ready(feed_forward(x, w1, b1, w2, b2))
    assert out_bf.shape == x.shape
    assert jnp.allclose(out_bf, ref, atol=1e-1, rtol=1e-1)

    # bf16 activations end-to-end (exercises the f32-scratch accumulator variant).
    out_bf_in = jax.block_until_ready(
        feed_forward(x.astype(jnp.bfloat16), w1, b1, w2, b2))
    assert out_bf_in.dtype == jnp.bfloat16
    assert jnp.allclose(out_bf_in.astype(jnp.float32), ref, atol=1e-1, rtol=1e-1)

    print("KERNEL_OK")
</pallas_src>

<mosaic_0001>
module attributes {stable_mosaic.version = 11 : i64} {
  func.func @_ffn_kernel_out_acc(%arg0: i32, %arg1: i32, %arg2: memref<16x128xf32, #tpu.memory_space<vmem>>, %arg3: memref<128x128xf32, #tpu.memory_space<vmem>>, %arg4: memref<1x128xf32, #tpu.memory_space<vmem>>, %arg5: memref<128x128xf32, #tpu.memory_space<vmem>>, %arg6: memref<1x128xf32, #tpu.memory_space<vmem>>, %arg7: memref<16x128xf32, #tpu.memory_space<vmem>>) attributes {dimension_semantics = [#tpu.dimension_semantics<parallel>, #tpu.dimension_semantics<arbitrary>], iteration_bounds = array<i64: 1, 1>, scalar_prefetch = 0 : i64, scratch_operands = 0 : i64, tpu.core_type = #tpu.core_type<tc>, window_params = [{transform_indices = @transform_0, window_bounds = array<i64: 16, 128>}, {transform_indices = @transform_1, window_bounds = array<i64: 128, 128>}, {transform_indices = @transform_2, window_bounds = array<i64: 1, 128>}, {transform_indices = @transform_3, window_bounds = array<i64: 128, 128>}, {pipeline_mode = #tpu.pipeline_mode<synchronous>, transform_indices = @transform_4, window_bounds = array<i64: 1, 128>}, {transform_indices = @transform_5, window_bounds = array<i64: 16, 128>}]} {
    %c0 = arith.constant 0 : index
    %c0_0 = arith.constant 0 : index
    %0 = vector.load %arg2[%c0, %c0_0] : memref<16x128xf32, #tpu.memory_space<vmem>>, vector<16x128xf32>
    %c0_1 = arith.constant 0 : index
    %c0_2 = arith.constant 0 : index
    %1 = vector.load %arg3[%c0_1, %c0_2] : memref<128x128xf32, #tpu.memory_space<vmem>>, vector<128x128xf32>
    %cst = arith.constant dense<0.000000e+00> : vector<16x128xf32>
    %2 = tpu.matmul %0, %1, %cst {dimension_numbers = #tpu.dot_dimension_numbers<[1], [0], [0], [1], [0, 0, 1, 1], [], []>} : vector<16x128xf32>, vector<128x128xf32>, vector<16x128xf32> -> vector<16x128xf32>
    %c0_3 = arith.constant 0 : index
    %c0_4 = arith.constant 0 : index
    %3 = vector.load %arg4[%c0_3, %c0_4] : memref<1x128xf32, #tpu.memory_space<vmem>>, vector<1x128xf32>
    %4 = vector.broadcast %3 : vector<1x128xf32> to vector<16x128xf32>
    %5 = arith.addf %2, %4 : vector<16x128xf32>
    %cst_5 = arith.constant 0.000000e+00 : f32
    %6 = vector.broadcast %cst_5 : f32 to vector<16x128xf32>
    %7 = arith.maximumf %5, %6 : vector<16x128xf32>
    %c0_6 = arith.constant 0 : index
    %c0_7 = arith.constant 0 : index
    %8 = vector.load %arg5[%c0_6, %c0_7] : memref<128x128xf32, #tpu.memory_space<vmem>>, vector<128x128xf32>
    %cst_8 = arith.constant dense<0.000000e+00> : vector<16x128xf32>
    %9 = tpu.matmul %7, %8, %cst_8 {dimension_numbers = #tpu.dot_dimension_numbers<[1], [0], [0], [1], [0, 0, 1, 1], [], []>} : vector<16x128xf32>, vector<128x128xf32>, vector<16x128xf32> -> vector<16x128xf32>
    %c0_i32 = arith.constant 0 : i32
    %10 = arith.cmpi eq, %arg1, %c0_i32 : i32
    %11 = arith.extui %10 : i1 to i32
    %c0_i32_9 = arith.constant 0 : i32
    %12 = arith.cmpi ne, %11, %c0_i32_9 : i32
    scf.if %12 {
      %c0_12 = arith.constant 0 : index
      %c0_13 = arith.constant 0 : index
      %16 = vector.load %arg6[%c0_12, %c0_13] : memref<1x128xf32, #tpu.memory_space<vmem>>, vector<1x128xf32>
      %17 = vector.broadcast %16 : vector<1x128xf32> to vector<16x128xf32>
      %18 = arith.addf %9, %17 : vector<16x128xf32>
      %c0_14 = arith.constant 0 : index
      %c0_15 = arith.constant 0 : index
      %19 = vector.load %arg7[%c0_14, %c0_15] : memref<16x128xf32, #tpu.memory_space<vmem>>, vector<16x128xf32>
      tpu.vector_store %arg7[%c0_14, %c0_15], %18 {strides = array<i32>} : memref<16x128xf32, #tpu.memory_space<vmem>>, vector<16x128xf32>,
    } else {
    }
    %c0_i32_10 = arith.constant 0 : i32
    %13 = arith.cmpi sgt, %arg1, %c0_i32_10 : i32
    %14 = arith.extui %13 : i1 to i32
    %c0_i32_11 = arith.constant 0 : i32
    %15 = arith.cmpi ne, %14, %c0_i32_11 : i32
    scf.if %15 {
      %c0_12 = arith.constant 0 : index
      %c0_13 = arith.constant 0 : index
      %16 = vector.load %arg7[%c0_12, %c0_13] : memref<16x128xf32, #tpu.memory_space<vmem>>, vector<16x128xf32>
      %17 = arith.addf %16, %9 : vector<16x128xf32>
      %c0_14 = arith.constant 0 : index
      %c0_15 = arith.constant 0 : index
      %18 = vector.load %arg7[%c0_14, %c0_15] : memref<16x128xf32, #tpu.memory_space<vmem>>, vector<16x128xf32>
      tpu.vector_store %arg7[%c0_14, %c0_15], %17 {strides = array<i32>} : memref<16x128xf32, #tpu.memory_space<vmem>>, vector<16x128xf32>,
    } else {
    }
    return
  }
  func.func @transform_0(%arg0: i32, %arg1: i32) -> (i32, i32) {
    %c0_i32 = arith.constant 0 : i32
    %c0_i32_0 = arith.constant 0 : i32
    return %arg0, %c0_i32 : i32, i32
  }
  func.func @transform_1(%arg0: i32, %arg1: i32) -> (i32, i32) {
    %c0_i32 = arith.constant 0 : i32
    %c0_i32_0 = arith.constant 0 : i32
    return %c0_i32, %arg1 : i32, i32
  }
  func.func @transform_2(%arg0: i32, %arg1: i32) -> (i32, i32) {
    %c0_i32 = arith.constant 0 : i32
    %c0_i32_0 = arith.constant 0 : i32
    return %c0_i32, %arg1 : i32, i32
  }
  func.func @transform_3(%arg0: i32, %arg1: i32) -> (i32, i32) {
    %c0_i32 = arith.constant 0 : i32
    %c0_i32_0 = arith.constant 0 : i32
    return %arg1, %c0_i32 : i32, i32
  }
  func.func @transform_4(%arg0: i32, %arg1: i32) -> (i32, i32) {
    %c0_i32 = arith.constant 0 : i32
    %c0_i32_0 = arith.constant 0 : i32
    %c0_i32_1 = arith.constant 0 : i32
    return %c0_i32, %c0_i32_0 : i32, i32
  }
  func.func @transform_5(%arg0: i32, %arg1: i32) -> (i32, i32) {
    %c0_i32 = arith.constant 0 : i32
    %c0_i32_0 = arith.constant 0 : i32
    return %arg0, %c0_i32 : i32, i32
  }
}

</mosaic_0001>

<bundles_post_ra>
// kernel: tpu_custom_call.1
= control target key start
LH: loop header
LB: loop body
LE: loop exit
PB: predicated region body
PF: predicated region fallthrough
CT: control target
= control target key end

     0   :  { %10 = vsyncpa [#allocation3], 0  ;;  %s564_s0 = inlined_call_operand.hbm [shape: f32[16,128], index: 0, kind: input, shape index: {}]   ;;  %s565_s1 = inlined_call_operand.hbm [shape: f32[128,128], index: 1, kind: input, shape index: {}]   ;;  %s566_s2 = inlined_call_operand.vmem [shape: f32[1,128], index: 2, kind: input, shape index: {}]   ;;  %s567_s3 = inlined_call_operand.hbm [shape: f32[128,128], index: 3, kind: input, shape index: {}]   ;;  %s568_s4 = inlined_call_operand.vmem [shape: f32[1,128], index: 4, kind: input, shape index: {}]   ;;  %s569_s5 = inlined_call_operand.hbm [shape: f32[16,128], index: 5, kind: output, shape index: {}]  }
   0x1   :  { %11 = vsyncpa [#allocation6], 0 }
   0x2   :  { %12 = vsyncpa [#allocation4], 0  ;;  %s498_s18 = smov [#allocation5]   ;;  %s499_s20 = smov [#allocation2]  }
   0x3   :  { %s30_s19 = sshll.u32 %s498_s18, 4  ;;  %s18_s21 = sshll.u32 %s499_s20, 4  ;;  %s31_s19 = int_to_ptr.vmem [resolvable:$true] %s30_s19  ;;  %s19_s21 = int_to_ptr.vmem [resolvable:$true] %s18_s21 }
   0x4   :  { %s420_s22 = scalar_lea.vmem %s31_s19, 2048  ;;  %p425_p1 = scmp.lt.s32.totalorder %s31_s19, %s31_s19 }
   0x5   :  { %p421_p0 = scmp.ne.s32.totalorder %s31_s19, %s420_s22  ;;  %p426_p2 = scmp.lt.s32.totalorder %s420_s22, %s420_s22 }
   0x7   :  { %p427_p3 = por %p426_p2, %p425_p1 }
   0x9   :  { %p428_p4 = pnand %p427_p3, %p421_p0 }
   0xb   :  { %431 = shalt.err (!%p428_p4)
}
   0xc   :  { %s500_s23 = smov 128   ;;  %s501_s24 = smov 8  }
   0xd   :  { %36 = dma.hbm_to_vmem [thread:$0]  %s565_s1, 2048, %s31_s19, [#allocation6], %s500_s23, %s500_s23, %s501_s24  }
   0xe   :  { %s440_s27 = scalar_lea.vmem %s19_s21, 256  ;;  %p445_p6 = scmp.lt.s32.totalorder %s19_s21, %s19_s21 }
   0xf   :  { %p441_p5 = scmp.ne.s32.totalorder %s19_s21, %s440_s27  ;;  %p446_p7 = scmp.lt.s32.totalorder %s440_s27, %s440_s27 }
  0x11   :  { %p447_p8 = por %p446_p7, %p445_p6 }
  0x13   :  { %p448_p9 = pnand %p447_p8, %p441_p5 }
  0x15   :  { %451 = shalt.err (!%p448_p9)
}
  0x16   :  { %24 = dma.hbm_to_vmem [thread:$0]  %s564_s0, 256, %s19_s21, [#allocation3], %s500_s23, %s500_s23, %s501_s24  }
  0x17   :  { %s502_s30 = smov [#allocation7]  }
  0x18   :  { %s44_s6 = sshll.u32 %s502_s30, 4  ;;  %s45_s6 = int_to_ptr.vmem [resolvable:$true] %s44_s6 }
  0x19   :  { %s460_s7 = scalar_lea.vmem %s45_s6, 2048  ;;  %p465_p11 = scmp.lt.s32.totalorder %s45_s6, %s45_s6 }
  0x1a   :  { %p461_p10 = scmp.ne.s32.totalorder %s45_s6, %s460_s7  ;;  %p466_p12 = scmp.lt.s32.totalorder %s460_s7, %s460_s7 }
  0x1c   :  { %p467_p13 = por %p466_p12, %p465_p11 }
  0x1e   :  { %p468_p0 = pnand %p467_p13, %p461_p10 }
  0x20   :  { %471 = shalt.err (!%p468_p0)
}
  0x21   :  { %50 = dma.hbm_to_vmem [thread:$0]  %s567_s3, 2048, %s45_s6, [#allocation6], %s500_s23, %s500_s23, %s501_s24  }
  0x22   :  { %492 = dma.done.wait [#allocation3], 256  }
  0x23   :  { %493 = vsyncadd [#allocation3], 4294967040 }
  0x24   :  { %494 = dma.done.wait [#allocation6], 4096  }
  0x25   :  { %495 = vsyncadd [#allocation6], 4294963200  ;;  %v79_v0 = vld [vmem:[#allocation5 + $0x78] sm:$0xff]  ;;  %v78_v1 = vld [vmem:[#allocation5 + $0x70] sm:$0xff]  ;;  %s503_s11 = smov [#allocation8]  }
  0x26   :  { %336 = vmatprep.subr.mxu0 %v79_v0  ;;  %v77_v2 = vld [vmem:[#allocation5 + $0x68] sm:$0xff]  ;;  %v76_v3 = vld [vmem:[#allocation5 + $0x60] sm:$0xff]  ;;  %v62_v4 = vld [vmem:[#allocation2] sm:$0xff]  ;;  %s285_s12 = sshll.u32 %s503_s11, 4  ;;  %s286_s12 = int_to_ptr.vmem [resolvable:$true] %s285_s12 }
  0x27   :  { %337 = vmatpush3.msra.mxu0 %v79_v0  ;;  %v75_v5 = vld [vmem:[#allocation5 + $0x58] sm:$0xff]  ;;  %368 = vmatprep.mubr.f32.mxu0 %v62_v4  ;;  %v178_v7 = vld [vmem:[#allocation7 + $0x70] sm:$0xff]  ;;  %v177_v9 = vld [vmem:[#allocation7 + $0x68] sm:$0xff]  ;;  %p477_p2 = scmp.lt.s32.totalorder %s286_s12, %s286_s12 }
  0x28   :  { %338 = vmatprep.subr.mxu0 %v78_v1  ;;  %v179_v6 = vld [vmem:[#allocation7 + $0x78] sm:$0xff]  ;;  %v74_v8 = vld [vmem:[#allocation5 + $0x50] sm:$0xff]  ;;  %v73_v10 = vld [vmem:[#allocation5 + $0x48] sm:$0xff] }
  0x29   :  { %339 = vmatpush3.msra.mxu0 %v78_v1  ;;  %371 = vmatprep.subr.mxu1 %v179_v6  ;;  %v176_v11 = vld [vmem:[#allocation7 + $0x60] sm:$0xff]  ;;  %v175_v13 = vld [vmem:[#allocation7 + $0x58] sm:$0xff]  ;;  %v174_v15 = vld [vmem:[#allocation7 + $0x50] sm:$0xff] }
  0x2a   :  { %340 = vmatprep.subr.mxu0 %v77_v2  ;;  %372 = vmatpush3.msra.mxu1 %v179_v6  ;;  %v72_v12 = vld [vmem:[#allocation5 + $0x40] sm:$0xff]  ;;  %v71_v14 = vld [vmem:[#allocation5 + $0x38] sm:$0xff]  ;;  %v70_v16 = vld [vmem:[#allocation5 + $0x30] sm:$0xff] }
  0x2b   :  { %341 = vmatpush3.msra.mxu0 %v77_v2  ;;  %373 = vmatprep.subr.mxu1 %v178_v7  ;;  %v173_v17 = vld [vmem:[#allocation7 + $0x48] sm:$0xff]  ;;  %v172_v19 = vld [vmem:[#allocation7 + $0x40] sm:$0xff]  ;;  %v171_v21 = vld [vmem:[#allocation7 + $0x38] sm:$0xff] }
  0x2c   :  { %342 = vmatprep.subr.mxu0 %v76_v3  ;;  %374 = vmatpush3.msra.mxu1 %v178_v7  ;;  %v69_v18 = vld [vmem:[#allocation5 + $0x28] sm:$0xff]  ;;  %v68_v20 = vld [vmem:[#allocation5 + $0x20] sm:$0xff]  ;;  %v67_v22 = vld [vmem:[#allocation5 + $0x18] sm:$0xff] }
  0x2d   :  { %343 = vmatpush3.msra.mxu0 %v76_v3  ;;  %375 = vmatprep.subr.mxu1 %v177_v9  ;;  %v170_v23 = vld [vmem:[#allocation7 + $0x30] sm:$0xff]  ;;  %v169_v25 = vld [vmem:[#allocation7 + $0x28] sm:$0xff]  ;;  %v168_v27 = vld [vmem:[#allocation7 + $0x20] sm:$0xff] }
  0x2e   :  { %344 = vmatprep.subr.mxu0 %v75_v5  ;;  %376 = vmatpush3.msra.mxu1 %v177_v9  ;;  %v66_v24 = vld [vmem:[#allocation5 + $0x10] sm:$0xff]  ;;  %v65_v26 = vld [vmem:[#allocation5 + $0x8] sm:$0xff]  ;;  %v64_v28 = vld [vmem:[#allocation5] sm:$0xff] }
  0x2f   :  { %345 = vmatpush3.msra.mxu0 %v75_v5  ;;  %377 = vmatprep.subr.mxu1 %v176_v11  ;;  %v63_v29 = vld [vmem:[#allocation2 + $0x8] sm:$0xff]  ;;  %v166_v31 = vld [vmem:[#allocation7 + $0x10] sm:$0xff]  ;;  %v165_v32 = vld [vmem:[#allocation7 + $0x8] sm:$0xff] }
  0x30   :  { %346 = vmatprep.subr.mxu0 %v74_v8  ;;  %378 = vmatpush3.msra.mxu1 %v176_v11  ;;  %v167_v30 = vld [vmem:[#allocation7 + $0x18] sm:$0xff]  ;;  %v164_v33 = vld [vmem:[#allocation7] sm:$0xff]  ;;  %v298_v34 = vld [vmem:[%s566_s2] ss:$0 sm:$0xff]  ;;  %s472_s2 = scalar_lea.vmem %s286_s12, 256 }
  0x31   :  { %347 = vmatpush3.msra.mxu0 %v74_v8  ;;  %379 = vmatprep.subr.mxu1 %v175_v13  ;;  %v299_v41 = vld [vmem:[%s568_s4] ss:$0 sm:$0xff]  ;;  %p473_p1 = scmp.ne.s32.totalorder %s286_s12, %s472_s2  ;;  %p478_p3 = scmp.lt.s32.totalorder %s472_s2, %s472_s2 }
  0x32   :  { %348 = vmatprep.subr.mxu0 %v73_v10  ;;  %380 = vmatpush3.msra.mxu1 %v175_v13 }
  0x33   :  { %349 = vmatpush3.msra.mxu0 %v73_v10  ;;  %381 = vmatprep.subr.mxu1 %v174_v15  ;;  %p479_p4 = por %p478_p3, %p477_p2 }
  0x34   :  { %350 = vmatprep.subr.mxu0 %v72_v12  ;;  %382 = vmatpush3.msra.mxu1 %v174_v15 }
  0x35   :  { %351 = vmatpush3.msra.mxu0 %v72_v12  ;;  %383 = vmatprep.subr.mxu1 %v173_v17  ;;  %p480_p5 = pnand %p479_p4, %p473_p1 }
  0x36   :  { %352 = vmatprep.subr.mxu0 %v71_v14  ;;  %384 = vmatpush3.msra.mxu1 %v173_v17 }
  0x37   :  { %353 = vmatpush3.msra.mxu0 %v71_v14  ;;  %385 = vmatprep.subr.mxu1 %v172_v19 }
  0x38   :  { %354 = vmatprep.subr.mxu0 %v70_v16  ;;  %386 = vmatpush3.msra.mxu1 %v172_v19 }
  0x39   :  { %355 = vmatpush3.msra.mxu0 %v70_v16  ;;  %387 = vmatprep.subr.mxu1 %v171_v21 }
  0x3a   :  { %356 = vmatprep.subr.mxu0 %v69_v18  ;;  %388 = vmatpush3.msra.mxu1 %v171_v21 }
  0x3b   :  { %357 = vmatpush3.msra.mxu0 %v69_v18  ;;  %389 = vmatprep.subr.mxu1 %v170_v23 }
  0x3c   :  { %358 = vmatprep.subr.mxu0 %v68_v20  ;;  %390 = vmatpush3.msra.mxu1 %v170_v23 }
  0x3d   :  { %359 = vmatpush3.msra.mxu0 %v68_v20  ;;  %391 = vmatprep.subr.mxu1 %v169_v25 }
  0x3e   :  { %360 = vmatprep.subr.mxu0 %v67_v22  ;;  %392 = vmatpush3.msra.mxu1 %v169_v25 }
  0x3f   :  { %361 = vmatpush3.msra.mxu0 %v67_v22  ;;  %393 = vmatprep.subr.mxu1 %v168_v27 }
  0x40   :  { %362 = vmatprep.subr.mxu0 %v66_v24  ;;  %394 = vmatpush3.msra.mxu1 %v168_v27 }
  0x41   :  { %363 = vmatpush3.msra.mxu0 %v66_v24  ;;  %395 = vmatprep.subr.mxu1 %v167_v30 }
  0x42   :  { %364 = vmatprep.subr.mxu0 %v65_v26  ;;  %396 = vmatpush3.msra.mxu1 %v167_v30 }
  0x43   :  { %365 = vmatpush3.msra.mxu0 %v65_v26  ;;  %397 = vmatprep.subr.mxu1 %v166_v31 }
  0x44   :  { %366 = vmatprep.subr.mxu0 %v64_v28  ;;  %398 = vmatpush3.msra.mxu1 %v166_v31 }
  0x45   :  { %367 = vmatpush3.msra.mxu0 %v64_v28  ;;  %399 = vmatprep.subr.mxu1 %v165_v32 }
  0x46   :  { %369 = vmatmul.mubr.f32.vlgmr.msra.gmra.mxu0 %v63_v29  ;;  %400 = vmatpush3.msra.mxu1 %v165_v32 }
  0x47   :  { %401 = vmatprep.subr.mxu1 %v164_v33 }
  0x48   :  { %402 = vmatpush3.msra.mxu1 %v164_v33 }
 0x106   :  { %v370_v35 = vpop.f32.mrf.mxu0 }
 0x107   :  { %v159_v36 = vadd.f32 %v370_v35, %v298_v34 }
 0x108   :  { %v153_v37 = vpop.f32.mrf.mxu0 }
 0x109   :  { %v154_v38 = vadd.f32 %v298_v34, %v153_v37  ;;  %v163_v40 = vmax.f32 %v159_v36, 0.0 }
 0x10b   :  { %v162_v39 = vmax.f32 %v154_v38, 0.0 }
 0x10d   :  { %403 = vmatprep.mubr.f32.mxu1 %v162_v39 }
 0x10e   :  { %404 = vmatmul.mubr.f32.vlgmr.msra.gmra.mxu1 %v163_v40 }
 0x1ce   :  { %v405_v42 = vpop.f32.mrf.mxu1 }
 0x1cf   :  { %v267_v43 = vadd.f32 %v405_v42, %v299_v41 }
 0x1d0   :  { %v246_v44 = vpop.f32.mrf.mxu1 }
 0x1d1   :  { %269 = vst [vmem:[#allocation8 + $0x8] sm:$0xff] %v267_v43  ;;  %v266_v45 = vadd.f32 %v299_v41, %v246_v44 }
 0x1d3   :  { %268 = vst [vmem:[#allocation8] sm:$0xff] %v266_v45 }
 0x1d4   :  { %483 = shalt.err (!%p480_p5)
}
 0x1d5   :  { %291 = dma.vmem_to_hbm [thread:$0]  %s286_s12, 256, %s569_s5, [#allocation4], %s500_s23, %s500_s23, %s501_s24  }
 0x1d6   :  { %496 = dma.done.wait [#allocation4], 256  }
 0x1d7   :  { %497 = vsyncadd [#allocation4], 4294967040 }
 0x1d8   :  { %295 = vsyncpa [#allocation3], 1 }
 0x1d9   :  { %296 = vsyncpa [#allocation6], 1 }
 0x1da   :  { %297 = vsyncpa [#allocation4], 1 }

</bundles_post_ra>
